<compile_context>
chip_gen: v5e
topology: v5e:2x2
jax: 0.10.0
libtpu: 0.0.40
codegen_flags: <defaults>
</compile_context>

<pallas_src>
import functools

import jax
import jax.numpy as jnp
from jax import lax
from jax.experimental import pallas as pl
from jax.experimental.pallas import tpu as pltpu


def _round_up(x, m):
    return (x + m - 1) // m * m


def _unet_compress_kernel(p_ref, w_ref, o_ref, *, negative_slope, eps, true_p):
    # p_ref: (1, CKK_pad, P_pad) bf16 block for one instance
    # w_ref: (C_out, CKK_pad)    bf16
    # o_ref: (1, C_out, P_pad)   f32
    patches = p_ref[0]                    # (CKK_pad, P_pad)
    w = w_ref[...]                        # (C_out, CKK_pad)

    # Conv as a single MXU matmul, f32 accumulation. Output is lane-dense (P on lanes).
    y = jnp.dot(w, patches, preferred_element_type=jnp.float32)   # (C_out, P_pad)

    # InstanceNorm2d (affine=False, biased variance, eps inside rsqrt).
    # One pass: sum and sum-of-squares.  Padded P columns are exactly zero
    # (zero-padded patches), so they contribute nothing; divide by the true P.
    inv_p = jnp.float32(1.0 / true_p)
    mean = jnp.sum(y, axis=-1, keepdims=True) * inv_p              # (C_out, 1)
    mean_sq = jnp.sum(y * y, axis=-1, keepdims=True) * inv_p       # (C_out, 1)
    var = jnp.maximum(mean_sq - mean * mean, 0.0)
    y_norm = (y - mean) * lax.rsqrt(var + eps)

    # LeakyReLU(0.2): single mul + max (slope < 1).
    out = jnp.maximum(y_norm, negative_slope * y_norm)

    o_ref[0] = out.astype(o_ref.dtype)


def unet_compress(x_nchw, weight, *, stride=2, padding=1, negative_slope=0.2,
                  eps=1e-5):
    """x_nchw: (N, C_in, H, W) float32; weight: (C_out, C_in, K, K) float32."""
    N, C_in, H, W = x_nchw.shape
    C_out, _, K, _ = weight.shape
    H_out = (H + 2 * padding - K) // stride + 1
    W_out = (W + 2 * padding - K) // stride + 1
    P = H_out * W_out
    CKK = C_in * K * K

    # Padded sizes for lane/sublane-dense blocks.
    P_pad = _round_up(P, 128)
    CKK_pad = _round_up(CKK, 8)

    # --- glue: im2col directly in (N, CKK, P) layout (no extra transpose) ---
    xp = jnp.pad(x_nchw, ((0, 0), (0, 0), (padding, padding), (padding, padding)))
    cols = []
    for kh in range(K):
        for kw in range(K):
            cols.append(xp[:, :, kh:kh + stride * H_out:stride,
                               kw:kw + stride * W_out:stride])   # (N, C_in, H_out, W_out)
    # (N, C_in, K*K, H_out, W_out) with kk = kh*K + kw ; flatten (ci, kk) -> CKK
    # and (H_out, W_out) -> P.  This matches PyTorch weight.reshape(C_out, C_in*K*K).
    patches = jnp.stack(cols, axis=2).reshape(N, CKK, P)
    patches = jnp.pad(patches, ((0, 0), (0, CKK_pad - CKK), (0, P_pad - P)))
    patches = patches.astype(jnp.bfloat16)

    # Weight flattened consistently with the patch ordering: (C_out, CKK_pad)
    w_flat = weight.reshape(C_out, CKK)
    w_flat = jnp.pad(w_flat, ((0, 0), (0, CKK_pad - CKK))).astype(jnp.bfloat16)

    kernel = functools.partial(_unet_compress_kernel,
                               negative_slope=negative_slope, eps=eps, true_p=P)

    # VMEM budget: double-buffered patch block + weight + double-buffered output.
    patch_blk_bytes = CKK_pad * P_pad * 2          # bf16
    w_bytes = C_out * CKK_pad * 2                  # bf16
    out_blk_bytes = C_out * P_pad * 4              # f32
    vmem_bytes = 2 * patch_blk_bytes + 2 * w_bytes + 2 * out_blk_bytes + (4 << 20)
    vmem_limit = int(min(max(vmem_bytes, 16 << 20), 48 << 20))

    cost = pl.CostEstimate(
        flops=2 * N * C_out * CKK_pad * P_pad,
        transcendentals=0,
        bytes_accessed=patches.size * 2 + w_flat.size * 2 + N * C_out * P_pad * 4,
    )

    out = pl.pallas_call(
        kernel,
        out_shape=jax.ShapeDtypeStruct((N, C_out, P_pad), x_nchw.dtype),
        grid_spec=pltpu.PrefetchScalarGridSpec(
            num_scalar_prefetch=0,
            grid=(N,),
            in_specs=[
                pl.BlockSpec((1, CKK_pad, P_pad), lambda n: (n, 0, 0)),
                pl.BlockSpec((C_out, CKK_pad), lambda n: (0, 0)),
            ],
            out_specs=pl.BlockSpec((1, C_out, P_pad), lambda n: (n, 0, 0)),
        ),
        compiler_params=pltpu.CompilerParams(
            dimension_semantics=("parallel",),
            vmem_limit_bytes=vmem_limit,
        ),
        cost_estimate=cost,
    )(patches, w_flat)

    # (N, C_out, P_pad) -> drop lane padding -> (N, C_out, H_out, W_out): reshape only.
    if P_pad != P:
        out = out[:, :, :P]
    return out.reshape(N, C_out, H_out, W_out)


if __name__ == "__main__":
    # Small shapes consistent with the module: in_size=4, out_size=8, 16x16 spatial.
    N, C_in, H, W = 2, 4, 16, 16
    C_out, K = 8, 4

    key = jax.random.PRNGKey(0)
    kx, kw = jax.random.split(key)
    x = jax.random.normal(kx, (N, C_in, H, W), dtype=jnp.float32)
    # Deterministic Conv2d weight (kaiming-ish scale), bias=False per module.
    fan_in = C_in * K * K
    weight = jax.random.normal(kw, (C_out, C_in, K, K), dtype=jnp.float32) / jnp.sqrt(fan_in)

    y = unet_compress(x, weight)
    jax.block_until_ready(y)
    assert y.shape == (N, C_out, H // 2, W // 2)
    print("KERNEL_OK")
</pallas_src>

<mosaic_0001>
module attributes {stable_mosaic.version = 11 : i64} {
  func.func @_unet_compress_kernel(%arg0: i32, %arg1: memref<1x64x128xbf16, #tpu.memory_space<vmem>>, %arg2: memref<8x64xbf16, #tpu.memory_space<vmem>>, %arg3: memref<1x8x128xf32, #tpu.memory_space<vmem>>) attributes {dimension_semantics = [#tpu.dimension_semantics<parallel>], iteration_bounds = array<i64: 2>, scalar_prefetch = 0 : i64, scratch_operands = 0 : i64, tpu.core_type = #tpu.core_type<tc>, window_params = [{transform_indices = @transform_0, window_bounds = array<i64: 1, 64, 128>}, {pipeline_mode = #tpu.pipeline_mode<synchronous>, transform_indices = @transform_1, window_bounds = array<i64: 8, 64>}, {transform_indices = @transform_2, window_bounds = array<i64: 1, 8, 128>}]} {
    %c0 = arith.constant 0 : index
    %c0_0 = arith.constant 0 : index
    %c0_1 = arith.constant 0 : index
    %0 = vector.load %arg1[%c0, %c0_0, %c0_1] : memref<1x64x128xbf16, #tpu.memory_space<vmem>>, vector<1x64x128xbf16>
    %1 = vector.shape_cast %0 : vector<1x64x128xbf16> to vector<64x128xbf16>
    %c0_2 = arith.constant 0 : index
    %c0_3 = arith.constant 0 : index
    %2 = vector.load %arg2[%c0_2, %c0_3] : memref<8x64xbf16, #tpu.memory_space<vmem>>, vector<8x64xbf16>
    %cst = arith.constant dense<0.000000e+00> : vector<8x128xf32>
    %3 = tpu.matmul %2, %1, %cst {dimension_numbers = #tpu.dot_dimension_numbers<[1], [0], [0], [1], [0, 0, 1, 1], [], []>} : vector<8x64xbf16>, vector<64x128xbf16>, vector<8x128xf32> -> vector<8x128xf32>
    %cst_4 = arith.constant dense<0.000000e+00> : vector<8xf32>
    %4 = vector.multi_reduction <add>, %3, %cst_4 [1] : vector<8x128xf32> to vector<8xf32>
    %5 = vector.shape_cast %4 : vector<8xf32> to vector<8x1xf32>
    %cst_5 = arith.constant 1.562500e-02 : f32
    %6 = vector.broadcast %cst_5 : f32 to vector<8x1xf32>
    %7 = arith.mulf %5, %6 : vector<8x1xf32>
    %8 = arith.mulf %3, %3 : vector<8x128xf32>
    %cst_6 = arith.constant dense<0.000000e+00> : vector<8xf32>
    %9 = vector.multi_reduction <add>, %8, %cst_6 [1] : vector<8x128xf32> to vector<8xf32>
    %10 = vector.shape_cast %9 : vector<8xf32> to vector<8x1xf32>
    %cst_7 = arith.constant 1.562500e-02 : f32
    %11 = vector.broadcast %cst_7 : f32 to vector<8x1xf32>
    %12 = arith.mulf %10, %11 : vector<8x1xf32>
    %13 = arith.mulf %7, %7 : vector<8x1xf32>
    %14 = arith.subf %12, %13 : vector<8x1xf32>
    %cst_8 = arith.constant 0.000000e+00 : f32
    %15 = vector.broadcast %cst_8 : f32 to vector<8x1xf32>
    %16 = arith.maximumf %14, %15 : vector<8x1xf32>
    %17 = vector.broadcast %7 : vector<8x1xf32> to vector<8x128xf32>
    %18 = arith.subf %3, %17 : vector<8x128xf32>
    %cst_9 = arith.constant 9.99999974E-6 : f32
    %19 = vector.broadcast %cst_9 : f32 to vector<8x1xf32>
    %20 = arith.addf %16, %19 : vector<8x1xf32>
    %21 = math.rsqrt %20 : vector<8x1xf32>
    %22 = vector.broadcast %21 : vector<8x1xf32> to vector<8x128xf32>
    %23 = arith.mulf %18, %22 : vector<8x128xf32>
    %cst_10 = arith.constant 2.000000e-01 : f32
    %24 = vector.broadcast %cst_10 : f32 to vector<8x128xf32>
    %25 = arith.mulf %24, %23 : vector<8x128xf32>
    %26 = arith.maximumf %23, %25 : vector<8x128xf32>
    %c0_11 = arith.constant 0 : index
    %c0_12 = arith.constant 0 : index
    %c0_13 = arith.constant 0 : index
    %27 = vector.load %arg3[%c0_11, %c0_12, %c0_13] : memref<1x8x128xf32, #tpu.memory_space<vmem>>, vector<1x8x128xf32>
    %28 = vector.shape_cast %27 : vector<1x8x128xf32> to vector<8x128xf32>
    %29 = vector.shape_cast %26 : vector<8x128xf32> to vector<1x8x128xf32>
    tpu.vector_store %arg3[%c0_11, %c0_12, %c0_13], %29 {strides = array<i32>} : memref<1x8x128xf32, #tpu.memory_space<vmem>>, vector<1x8x128xf32>,
    return
  }
  func.func @transform_0(%arg0: i32) -> (i32, i32, i32) {
    %c0_i32 = arith.constant 0 : i32
    %c0_i32_0 = arith.constant 0 : i32
    %c0_i32_1 = arith.constant 0 : i32
    return %arg0, %c0_i32, %c0_i32_0 : i32, i32, i32
  }
  func.func @transform_1(%arg0: i32) -> (i32, i32) {
    %c0_i32 = arith.constant 0 : i32
    %c0_i32_0 = arith.constant 0 : i32
    %c0_i32_1 = arith.constant 0 : i32
    return %c0_i32, %c0_i32_0 : i32, i32
  }
  func.func @transform_2(%arg0: i32) -> (i32, i32, i32) {
    %c0_i32 = arith.constant 0 : i32
    %c0_i32_0 = arith.constant 0 : i32
    %c0_i32_1 = arith.constant 0 : i32
    return %arg0, %c0_i32, %c0_i32_0 : i32, i32, i32
  }
}

</mosaic_0001>

<bundles_post_ra>
// kernel: tpu_custom_call.1
= control target key start
LH: loop header
LB: loop body
LE: loop exit
PB: predicated region body
PF: predicated region fallthrough
CT: control target
= control target key end

     0   :  { %7 = vsyncpa [#allocation3], 0  ;;  %s743_s0 = inlined_call_operand.hbm [shape: bf16[2,64,128], index: 0, kind: input, shape index: {}]   ;;  %s744_s1 = inlined_call_operand.hbm [shape: bf16[8,64], index: 1, kind: input, shape index: {}]   ;;  %s745_s2 = inlined_call_operand.hbm [shape: f32[2,8,128], index: 2, kind: output, shape index: {}]  }
   0x1   :  { %9 = vsyncpa [#allocation3 + $0x1], 0 }
   0x2   :  { %10 = vsyncpa [#allocation6], 0 }
   0x3   :  { %11 = vsyncpa [#allocation4], 0 }
   0x4   :  { %13 = vsyncpa [#allocation4 + $0x1], 0  ;;  %s600_s9 = smov 0   ;;  %s602_s10 = smov 0  }
   0x5   :  { %s604_s11 = smov 0   ;;  %s606_s12 = smov 0  }
   0x6 LB: > { %s621_s13 = sadd.s32 4294967295, %s580_s12   ;;  %s352_s14 = sadd.s32 4294967294, %s580_s12   ;;  %s580_s12 = sphi %s606_s12, %s756_s12   ;;  %s576_s11 = sphi %s604_s11, %s755_s11   ;;  %s572_s10 = sphi %s602_s10, %s754_s10   ;;  %s568_s9 = sphi %s600_s9, %s753_s9  }
   0x7   : > { %s625_s15 = sadd.s32 1, %s580_s12   ;;  %s26_s16 = sadd.s32 1, %s576_s11 }
   0x8   : > { %s23_s17 = ssub.s32 %s580_s12, %s625_s15  ;;  %p33_p0 = scmp.ne.s32.totalorder %s576_s11, %s572_s10 }
   0x9   : > { %p24_p1 = scmp.eq.s32.totalorder %s23_s17, 0  ;;  %p34_p2 = scmp.eq.s32.totalorder %s580_s12, 0 }
   0xa   : > { %p39_p3 = scmp.ne.s32.totalorder %s572_s10, %s568_s9  ;;  %p40_p4 = scmp.eq.s32.totalorder %s621_s13, 0 }
   0xb   : > { %s637_s18 = scalar_select %p24_p1, %s576_s11, %s26_s16  }
   0xc   : > { %p639_p5 = por %p34_p2, %p33_p0  ;;  %p645_p6 = por %p40_p4, %p39_p3 }
   0xd   : > { %p84_p7 = scmp.eq.s32.totalorder %s621_s13, 1  ;;  %p90_p8 = scmp.eq.s32.totalorder %s352_s14, 1 }
   0xe   : > { %p353_p9 = scmp.ge.s32.totalorder %s580_s12, 1  ;;  %p97_p10 = scmp.lt.s32.totalorder %s580_s12, 3 }
   0xf   : > { %p652_p11 = por %p84_p7, %p33_p0  ;;  %p656_p12 = por %p90_p8, %p39_p3 }
  0x10   : > { %p660_p13 = pnand %p353_p9, %p97_p10  ;;  %s109_s26 = sshll.u32 %s744_s1, 4  ;;  %s110_s26 = int_to_ptr.hbm [resolvable:$true] %s109_s26 }
  0x11   : > { %s582_s27 = smov [#allocation5]   ;;  %p410_p3 = scmp.lt.s32.totalorder %s580_s12, 2 }
  0x12   : > { %p397_p1 = pneg %p660_p13  ;;  %s111_s28 = sshll.u32 %s582_s27, 4  ;;  %s112_s28 = int_to_ptr.vmem [resolvable:$true] %s111_s28 }
  0x13   : > { %s122_s29 = sand.u32 1, %s576_s11   ;;  %p676_p7 = pnand %p410_p3, %p639_p5 }
  0x14   : > { %p398_p2 = pnand %p397_p1, %p40_p4  ;;  %s356_s3 = sshll.u32 %s122_s29, 5 }
  0x15   : > { %s384_s4 = sshll.u32 %s580_s12, 5  ;;  %s126_s14 = scalar_lea.vmem [#allocation2], %s356_s3 }
  0x16   : > { %400 = dma.hbm_to_vmem [thread:$0]  (!%p398_p2), %s110_s26, 64, %s112_s28, [#allocation6]  }
  0x17   : > { %s131_s7 = scalar_lea.hbm %s743_s0, %s384_s4  ;;  %s134_s16 = sshll.u32 %s126_s14, 4  ;;  %s135_s16 = int_to_ptr.vmem [resolvable:$true] %s134_s16 }
  0x18   : > { %s132_s8 = sshll.u32 %s131_s7, 4  ;;  %s123_s17 = scalar_lea.sflag [#allocation3], %s122_s29  ;;  %s133_s8 = int_to_ptr.hbm [resolvable:$true] %s132_s8 }
  0x19   : > { %s480_s24 = sshra.s32 %s133_s8, 4  ;;  %p484_p8 = pneg %p676_p7  ;;  %s481_s24 = int_to_ptr.hbm [resolvable:$true] %s480_s24 }
  0x1a   : > { %s482_s19 = scalar_lea.hbm %s481_s24, 32  ;;  %s487_s27 = scalar_lea.hbm %s743_s0, 64 }
  0x1b   : > { %p483_p5 = scmp.ne.s32.totalorder %s481_s24, %s482_s19  ;;  %p488_p1 = scmp.lt.s32.totalorder %s481_s24, %s743_s0 }
  0x1c   : > { %p489_p2 = scmp.lt.s32.totalorder %s487_s27, %s482_s19 }
  0x1d   : > { %p485_p9 = pnand %p484_p8, %p483_p5 }
  0x1e   : > { %p490_p3 = por %p489_p2, %p488_p1 }
  0x1f   : > { %p486_p10 = pneg %p485_p9 }
  0x21   : > { %p491_p0 = pnand %p490_p3, %p486_p10 }
  0x23   : > { %494 = shalt.err (!%p491_p0)
}
  0x24   : > { %s583_s29 = smov 64   ;;  %s584_s3 = smov 4  }
  0x25   : > { %404 = dma.hbm_to_vmem [thread:$0]  (!%p676_p7), %s133_s8, 512, %s135_s16, %s123_s17, %s583_s29, %s583_s29, %s584_s3  }
  0x26   : > { %146 = sbr.rel (%p660_p13) target bundleno = 347 (0x15b), region = 28  ;;  %s697_s5 = sand.u32 (!%p660_p13), 1, %s572_s10  }
  0x27   : > { %s360_s6 = sshll.u32 (!%p660_p13), %s697_s5, 5  ;;  %s149_s7 = scalar_lea.sflag (!%p660_p13), [#allocation3], %s697_s5 }
  0x28   : > { %s152_s14 = scalar_lea.vmem (!%p660_p13), [#allocation2], %s360_s6 }
  0x2b   : > { %555 = dma.done.wait (%p645_p6), %s149_s7, 512  }
  0x2c   : > { %557 = vsyncadd (%p645_p6), %s149_s7, 4294966784 }
  0x2d   : > { %559 = dma.done.wait (%p40_p4), [#allocation6], 64  }
  0x2e   : > { %561 = vsyncadd (%p40_p4), [#allocation6], 4294967232  ;;  %v388_v0 = vld [vmem:[%s152_s14 + $0x18] sm:$0xff]  ;;  %v387_v1 = vld [vmem:[%s152_s14 + $0x10] sm:$0xff]  ;;  %vm213_vm0 = vcmask 523264   ;;  %s362_s20 = sshll.u32 %s697_s5, 3 }
  0x2f   : > { %221 = vmatpush.bf16.msra.mxu0 %v388_v0  ;;  %v386_v2 = vld [vmem:[%s152_s14 + $0x8] sm:$0xff]  ;;  %v385_v3 = vld [vmem:[%s152_s14] sm:$0xff]  ;;  %s381_s23 = sshll.u32 %s621_s13, 3  ;;  %s178_s17 = scalar_lea.vmem [#allocation7], %s362_s20 }
  0x30   : > { %v188_v4 = vld [vmem:[#allocation5] sm:$0xf]  ;;  %s267_s16 = scalar_lea.hbm %s745_s2, %s381_s23  ;;  %s269_s24 = sshll.u32 %s178_s17, 4  ;;  %s270_s24 = int_to_ptr.vmem [resolvable:$true] %s269_s24 }
  0x31   : > { %s271_s19 = sshll.u32 %s267_s16, 4  ;;  %s257_s13 = scalar_lea.sflag [#allocation4], %s697_s5  ;;  %s272_s19 = int_to_ptr.hbm [resolvable:$true] %s271_s19 }
  0x32   : > { %s524_s25 = sshra.s32 %s272_s19, 4  ;;  %s530_s4 = scalar_lea.hbm %s745_s2, 16  ;;  %s525_s25 = int_to_ptr.hbm [resolvable:$true] %s524_s25 }
  0x33   : > { %222 = vmatpush.bf16.msra.mxu0 %v387_v1  ;;  %s526_s26 = scalar_lea.hbm %s525_s25, 8  ;;  %p531_p0 = scmp.lt.s32.totalorder %s525_s25, %s745_s2 }
  0x34   : > { %p527_p4 = scmp.ne.s32.totalorder %s525_s25, %s526_s26  ;;  %p532_p7 = scmp.lt.s32.totalorder %s530_s4, %s526_s26 }
  0x36   : > { %p528_p6 = pnand %p527_p4, %p652_p11  ;;  %p533_p5 = por %p532_p7, %p531_p0 }
  0x37   : > { %223 = vmatpush.bf16.msra.mxu0 %v386_v2 }
  0x38   : > { %p529_p13 = pneg %p528_p6 }
  0x3a   : > { %p534_p8 = pnand %p533_p5, %p529_p13 }
  0x3b   : > { %224 = vmatpush.bf16.msra.mxu0 %v385_v3 }
  0x3e   : > { %379 = vmatmul.msk.bf16.vlgmr.msra.gmra.mxu0 %vm213_vm0, %v188_v4 }
  0xbb   : > { %v226_v5 = vpop.f32.mrf.mxu0 }
  0xbc   : > { %230 = vadd.xlane.f32.xlu0 %v226_v5  ;;  %v233_v6 = vmul.f32 %v226_v5, %v226_v5 }
  0xc3   : > { %v228_v7 = vpop.f32.mrf.mxu0 }
  0xc4   : > { %234 = vadd.xlane.f32.xlu0 %v233_v6 }
 0x12f   : > { %v231_v8 = vpop.xlane.xlu0 %230 }
 0x130   : > { %v232_v9 = vmul.f32 0.015625, %v231_v8 }
 0x132   : > { %v237_v11 = vmul.f32 %v232_v9, %v232_v9  ;;  %v240_v22 = vsub.f32 %v226_v5, %v232_v9 }
 0x137   : > { %v235_v10 = vpop.xlane.xlu0 %234 }
 0x138   : > { %v236_v12 = vmul.f32 0.015625, %v235_v10 }
 0x13a   : > { %v238_v13 = vsub.f32 %v236_v12, %v237_v11 }
 0x13c   : > { %v239_v14 = vmax.f32 %v238_v13, 0.0 }
 0x13e   : > { %v241_v15 = vadd.f32 1e-05, %v239_v14 }
 0x140   : > { %448 = vrsqrt.f32 %v241_v15  ;;  %vm248_vm2 = vweird.f32 %v241_v15 }
 0x146   : > { %v449_v16 = vpop.eup %448 }
 0x147   : > { %v243_v17 = vmul.f32 %v449_v16, %v241_v15  ;;  %vm249_vm1 = vweird.f32 %v449_v16 }
 0x148   : > { %vm250_vm3 = vmor %vm248_vm2, %vm249_vm1 }
 0x149   : > { %v244_v18 = vmul.f32 %v449_v16, %v243_v17 }
 0x14b   : > { %v245_v19 = vmul.f32 0.5, %v244_v18 }
 0x14d   : > { %v246_v20 = vsub.f32 1.5, %v245_v19 }
 0x14f   : > { %v247_v21 = vmul.f32 %v449_v16, %v246_v20 }
 0x151   : > { %v251_v23 = vsel %vm250_vm3, %v449_v16, %v247_v21 }
 0x152   : > { %v252_v24 = vmul.f32 %v251_v23, %v240_v22 }
 0x154   : > { %v253_v25 = vmul.f32 0.2, %v252_v24 }
 0x156   : > { %v254_v26 = vmax.f32 %v252_v24, %v253_v25 }
 0x158   : > { %255 = vst [vmem:[%s178_s17] sm:$0xff] %v254_v26 }
 0x159   : > { %537 = shalt.err (!%p534_p8)
}
 0x15a   : > { %395 = dma.vmem_to_hbm [thread:$0]  (%p652_p11), %s270_s24, 128, %s272_s19, %s257_s13  }
 0x15b PF: > { %s283_s5 = sand.u32 1, %s568_s9   ;;  %p752_p9 = scmp.ge.s32.totalorder %s580_s12, 2 }
 0x15c   : > { %s284_s6 = scalar_lea.sflag [#allocation4], %s283_s5 }
 0x15d   : > { %p406_p10 = pnand %p752_p9, %p656_p12 }
 0x15f   : > { %p407_p1 = pneg %p406_p10 }
 0x161   : > { %563 = dma.done.wait (%p407_p1), %s284_s6, 128  }
 0x162   : > { %565 = vsyncadd (%p407_p1), %s284_s6, 4294967168  ;;  %p16_p2 = scmp.ge.s32.totalorder %s625_s15, 4   ;;  %s753_s9 = smov %s572_s10 }
 0x163   : > { %s754_s10 = smov %s576_s11  ;;  %s755_s11 = smov %s637_s18 }
 0x164   : > { %s756_s12 = smov %s625_s15  ;;  %18 = sbr.rel (!%p16_p2) target bundleno = 6 (0x6), region = 77 }
 0x169   :  { %290 = vsyncpa [#allocation3], 1 }
 0x16a   :  { %292 = vsyncpa [#allocation3 + $0x1], 1 }
 0x16b   :  { %293 = vsyncpa [#allocation6], 1 }
 0x16c   :  { %294 = vsyncpa [#allocation4], 1 }
 0x16d   :  { %296 = vsyncpa [#allocation4 + $0x1], 1 }

</bundles_post_ra>
